<compile_context>
chip_gen: v5e
topology: v5e:2x2
jax: 0.10.0
libtpu: 0.0.40
codegen_flags: <defaults>
</compile_context>

<pallas_src>
import math
import functools

import jax
import jax.numpy as jnp
from jax import lax
from jax.experimental import pallas as pl
from jax.experimental.pallas import tpu as pltpu


def _round_up(x, m):
    return (x + m - 1) // m * m


# ----------------------------------------------------------------------------
# Linear kernels
# ----------------------------------------------------------------------------
def _linear_kernel_nosplit(*refs, activation, has_residual):
    """Single-K-block matmul: y = act(x @ w + b) (+ residual), no accumulator."""
    if has_residual:
        x_ref, w_ref, b_ref, r_ref, o_ref = refs
    else:
        x_ref, w_ref, b_ref, o_ref = refs
        r_ref = None
    y = jnp.dot(x_ref[...], w_ref[...], preferred_element_type=jnp.float32)
    y = y + b_ref[...]
    if activation == "relu":
        y = jnp.maximum(y, 0.0)
    if has_residual:
        y = y + r_ref[...].astype(jnp.float32)
    o_ref[...] = y.astype(o_ref.dtype)


def _linear_kernel_ksplit(*refs, activation, has_residual, nk, acc_in_out):
    """K-tiled matmul.  f32 outputs accumulate directly in o_ref (no scratch)."""
    if has_residual:
        x_ref, w_ref, b_ref, r_ref, o_ref, *rest = refs
    else:
        x_ref, w_ref, b_ref, o_ref, *rest = refs
        r_ref = None
    acc_ref = o_ref if acc_in_out else rest[0]
    k = pl.program_id(2)

    @pl.when(k == 0)
    def _():
        acc_ref[...] = jnp.zeros_like(acc_ref)

    acc_ref[...] += jnp.dot(x_ref[...], w_ref[...],
                            preferred_element_type=jnp.float32)

    @pl.when(k == nk - 1)
    def _():
        y = acc_ref[...].astype(jnp.float32) + b_ref[...]
        if activation == "relu":
            y = jnp.maximum(y, 0.0)
        if has_residual:
            y = y + r_ref[...].astype(jnp.float32)
        o_ref[...] = y.astype(o_ref.dtype)


def linear_pallas(x, w, b, activation=None, residual=None,
                  out_dtype=jnp.bfloat16):
    """y = act(x @ w + b) (+ residual).

    x: [..., K] (cast to bf16 once here if needed), w: [K, Np] bf16 pre-padded
    at init so Np is a multiple of 128, b: [Np] f32.  Returns [..., Np]; the
    caller slices padded head outputs.
    """
    lead = x.shape[:-1]
    K = x.shape[-1]
    Np = w.shape[1]

    x2 = x.reshape(-1, K)
    if x2.dtype != jnp.bfloat16:
        x2 = x2.astype(jnp.bfloat16)
    M = x2.shape[0]

    tm = min(512, _round_up(M, 8))
    Mp = _round_up(M, tm)

    if Np <= 512:
        tn = Np
    elif Np % 512 == 0:
        tn = 512
    elif Np % 256 == 0:
        tn = 256
    else:
        tn = 128

    if K <= 512 or K % 128 != 0:
        tk = K                       # full-K block (legal: block == full dim)
    elif K % 512 == 0:
        tk = 512
    elif K % 256 == 0:
        tk = 256
    else:
        tk = 128
    nk = K // tk

    xp = x2 if Mp == M else jnp.pad(x2, ((0, Mp - M), (0, 0)))
    bp = b.astype(jnp.float32).reshape(1, Np)

    has_residual = residual is not None
    if has_residual:
        r2 = residual.reshape(-1, residual.shape[-1]).astype(jnp.bfloat16)
        if r2.shape[1] != Np:
            r2 = jnp.pad(r2, ((0, 0), (0, Np - r2.shape[1])))
        if Mp != M:
            r2 = jnp.pad(r2, ((0, Mp - M), (0, 0)))

    if nk == 1:
        in_specs = [
            pl.BlockSpec((tm, K), lambda i, j: (i, 0)),
            pl.BlockSpec((K, tn), lambda i, j: (0, j)),
            pl.BlockSpec((1, tn), lambda i, j: (0, j)),
        ]
        inputs = [xp, w, bp]
        if has_residual:
            in_specs.append(pl.BlockSpec((tm, tn), lambda i, j: (i, j)))
            inputs.append(r2)
        out = pl.pallas_call(
            functools.partial(_linear_kernel_nosplit, activation=activation,
                              has_residual=has_residual),
            grid=(Mp // tm, Np // tn),
            in_specs=in_specs,
            out_specs=pl.BlockSpec((tm, tn), lambda i, j: (i, j)),
            out_shape=jax.ShapeDtypeStruct((Mp, Np), out_dtype),
            compiler_params=pltpu.CompilerParams(
                dimension_semantics=("parallel", "parallel")),
        )(*inputs)
    else:
        acc_in_out = (out_dtype == jnp.float32)
        in_specs = [
            pl.BlockSpec((tm, tk), lambda i, j, k: (i, k)),
            pl.BlockSpec((tk, tn), lambda i, j, k: (k, j)),
            pl.BlockSpec((1, tn), lambda i, j, k: (0, j)),
        ]
        inputs = [xp, w, bp]
        if has_residual:
            in_specs.append(pl.BlockSpec((tm, tn), lambda i, j, k: (i, j)))
            inputs.append(r2)
        scratch = [] if acc_in_out else [pltpu.VMEM((tm, tn), jnp.float32)]
        out = pl.pallas_call(
            functools.partial(_linear_kernel_ksplit, activation=activation,
                              has_residual=has_residual, nk=nk,
                              acc_in_out=acc_in_out),
            grid=(Mp // tm, Np // tn, nk),
            in_specs=in_specs,
            out_specs=pl.BlockSpec((tm, tn), lambda i, j, k: (i, j)),
            out_shape=jax.ShapeDtypeStruct((Mp, Np), out_dtype),
            scratch_shapes=scratch,
            compiler_params=pltpu.CompilerParams(
                dimension_semantics=("parallel", "parallel", "arbitrary")),
        )(*inputs)

    if Mp != M:
        out = out[:M]
    return out.reshape(*lead, Np)


# ----------------------------------------------------------------------------
# LayerNorm (optional softsign activation + fused padded-frame zeroing)
# ----------------------------------------------------------------------------
def _layernorm_kernel(*refs, activation, eps, has_mask):
    if has_mask:
        x_ref, g_ref, b_ref, m_ref, o_ref = refs
    else:
        x_ref, g_ref, b_ref, o_ref = refs
        m_ref = None
    x = x_ref[...].astype(jnp.float32)
    mean = jnp.mean(x, axis=-1, keepdims=True)
    var = jnp.mean(jnp.square(x - mean), axis=-1, keepdims=True)
    y = (x - mean) * lax.rsqrt(var + eps)
    y = y * g_ref[...] + b_ref[...]
    if activation == "softsign":
        y = y / (1.0 + jnp.abs(y))
    if has_mask:
        y = y * m_ref[...]
    o_ref[...] = y.astype(o_ref.dtype)


def layernorm_pallas(x, g, b, activation=None, eps=1e-5, mask=None,
                     out_dtype=jnp.bfloat16):
    lead = x.shape[:-1]
    D = x.shape[-1]
    x2 = x.reshape(-1, D)
    M = x2.shape[0]
    tm = min(512, _round_up(M, 8))
    Mp = _round_up(M, tm)
    xp = x2 if Mp == M else jnp.pad(x2, ((0, Mp - M), (0, 0)))

    inputs = [xp, g.astype(jnp.float32).reshape(1, D),
              b.astype(jnp.float32).reshape(1, D)]
    in_specs = [
        pl.BlockSpec((tm, D), lambda i: (i, 0)),
        pl.BlockSpec((1, D), lambda i: (0, 0)),
        pl.BlockSpec((1, D), lambda i: (0, 0)),
    ]
    has_mask = mask is not None
    if has_mask:
        m2 = mask.reshape(-1, 1).astype(jnp.float32)
        if Mp != M:
            m2 = jnp.pad(m2, ((0, Mp - M), (0, 0)))
        inputs.append(m2)
        in_specs.append(pl.BlockSpec((tm, 1), lambda i: (i, 0)))

    out = pl.pallas_call(
        functools.partial(_layernorm_kernel, activation=activation, eps=eps,
                          has_mask=has_mask),
        grid=(Mp // tm,),
        in_specs=in_specs,
        out_specs=pl.BlockSpec((tm, D), lambda i: (i, 0)),
        out_shape=jax.ShapeDtypeStruct((Mp, D), out_dtype),
        compiler_params=pltpu.CompilerParams(dimension_semantics=("parallel",)),
    )(*inputs)
    if Mp != M:
        out = out[:M]
    return out.reshape(*lead, D)


# ----------------------------------------------------------------------------
# Attention (per-batch, all heads, bias built in-kernel from tiny key mask)
# ----------------------------------------------------------------------------
def _attn_kernel(q_ref, k_ref, v_ref, m_ref, o_ref, *, num_heads, scale, causal):
    # q_ref [1,Tq,H] / k_ref,v_ref [1,Tk,H] bf16 (views into packed QKV / KV).
    Tq = q_ref.shape[1]
    Tk = k_ref.shape[1]
    H = q_ref.shape[2]
    dh = H // num_heads

    q = q_ref[0]          # [Tq, H] bf16, lane-dense load
    k = k_ref[0]          # [Tk, H]
    v = v_ref[0]          # [Tk, H]

    # additive bias from the tiny [1, Tk] key-padding mask (+ optional causal)
    key_ok = m_ref[0] != 0
    bias = jnp.where(key_ok, 0.0, -1e9).astype(jnp.float32)          # [1, Tk]
    if causal:
        row = lax.broadcasted_iota(jnp.int32, (Tq, Tk), 0)
        col = lax.broadcasted_iota(jnp.int32, (Tq, Tk), 1)
        bias = bias + jnp.where(col <= row, 0.0, -1e9)

    # TODO(synk): for long sign sequences add a KV grid axis with online softmax
    # (flash-style) instead of whole-K/V blocks per batch.
    for h in range(num_heads):                # static unroll over heads
        lo = h * dh
        qh = q[:, lo:lo + dh]
        kh = k[:, lo:lo + dh]
        vh = v[:, lo:lo + dh]
        s = lax.dot_general(qh, kh, (((1,), (1,)), ((), ())),
                            preferred_element_type=jnp.float32)
        s = s * scale + bias
        s = s - jnp.max(s, axis=-1, keepdims=True)
        p = jnp.exp(s)
        p = p * pl.reciprocal(jnp.sum(p, axis=-1, keepdims=True), approx=True)
        ctx = jnp.dot(p.astype(jnp.bfloat16), vh,
                      preferred_element_type=jnp.float32)
        # write each head's context directly (no ctx list / concatenate)
        o_ref[0, :, pl.ds(lo, dh)] = ctx.astype(o_ref.dtype)


def _attention_call(inputs, in_specs, B, Tq, H, num_heads, causal):
    dh = H // num_heads
    return pl.pallas_call(
        functools.partial(_attn_kernel, num_heads=num_heads,
                          scale=1.0 / math.sqrt(dh), causal=causal),
        grid=(B,),
        in_specs=in_specs,
        out_specs=pl.BlockSpec((1, Tq, H), lambda b: (b, 0, 0)),
        out_shape=jax.ShapeDtypeStruct((B, Tq, H), jnp.bfloat16),
        compiler_params=pltpu.CompilerParams(dimension_semantics=("parallel",)),
    )(*inputs)


def attention_packed_qkv(qkv, key_mask, num_heads, causal=False):
    """Self-attention.  qkv: packed [B, T, 3H] bf16; Q/K/V split via BlockSpec."""
    B, T, H3 = qkv.shape
    H = H3 // 3
    m = key_mask.astype(jnp.int32).reshape(B, 1, T)
    in_specs = [
        pl.BlockSpec((1, T, H), lambda b: (b, 0, 0)),   # Q  = qkv[..., :H]
        pl.BlockSpec((1, T, H), lambda b: (b, 0, 1)),   # K  = qkv[..., H:2H]
        pl.BlockSpec((1, T, H), lambda b: (b, 0, 2)),   # V  = qkv[..., 2H:]
        pl.BlockSpec((1, 1, T), lambda b: (b, 0, 0)),
    ]
    return _attention_call((qkv, qkv, qkv, m), in_specs, B, T, H, num_heads,
                           causal)


def attention_packed_kv(q, kv, key_mask, num_heads, causal=False):
    """Cross-attention.  q: [B, Tq, H] bf16; kv: packed [B, Tk, 2H] bf16."""
    B, Tq, H = q.shape
    Tk = kv.shape[1]
    m = key_mask.astype(jnp.int32).reshape(B, 1, Tk)
    in_specs = [
        pl.BlockSpec((1, Tq, H), lambda b: (b, 0, 0)),
        pl.BlockSpec((1, Tk, H), lambda b: (b, 0, 0)),  # K = kv[..., :H]
        pl.BlockSpec((1, Tk, H), lambda b: (b, 0, 1)),  # V = kv[..., H:]
        pl.BlockSpec((1, 1, Tk), lambda b: (b, 0, 0)),
    ]
    return _attention_call((q, kv, kv, m), in_specs, B, Tq, H, num_heads,
                           causal)


# ----------------------------------------------------------------------------
# Model glue (masks, positional encoding, embedding gather) in plain JAX
# ----------------------------------------------------------------------------
def sinusoidal_pe(T, H):
    pos = jnp.arange(T, dtype=jnp.float32)[:, None]
    i = jnp.arange(0, H, 2, dtype=jnp.float32)
    div = jnp.exp(-math.log(10000.0) * i / H)
    pe = jnp.zeros((T, H), jnp.float32)
    pe = pe.at[:, 0::2].set(jnp.sin(pos * div))
    pe = pe.at[:, 1::2].set(jnp.cos(pos * div))
    return pe


def multi_head_attention(p, q_in, kv_in, key_mask, num_heads, causal=False,
                         residual=None):
    if "w_qkv" in p:                       # self-attention: fused QKV matmul
        qkv = linear_pallas(q_in, p["w_qkv"], p["b_qkv"])
        ctx = attention_packed_qkv(qkv, key_mask, num_heads, causal=causal)
    else:                                  # cross-attention: fused KV matmul
        q = linear_pallas(q_in, p["w_q"], p["b_q"])
        kv = linear_pallas(kv_in, p["w_kv"], p["b_kv"])
        ctx = attention_packed_kv(q, kv, key_mask, num_heads, causal=causal)
    # residual add fused into the output-projection epilogue
    return linear_pallas(ctx, p["wo"], p["bo"], residual=residual)


def spatial_embeddings(p, sgn, sgn_key_mask):
    x = linear_pallas(sgn, p["w"], p["b"])
    # TODO(synk): MaskedNorm approximated by plain LN + zeroing padded frames
    # (zeroing fused into the LN epilogue); LN stats still include padding.
    return layernorm_pallas(x, p["ln_g"], p["ln_b"], activation="softsign",
                            mask=sgn_key_mask)


def encoder_layer(p, x, src_key_mask, num_heads):
    xn = layernorm_pallas(x, p["ln1_g"], p["ln1_b"])
    h = multi_head_attention(p["attn"], xn, xn, src_key_mask, num_heads,
                             causal=False, residual=x)
    hn = layernorm_pallas(h, p["ln2_g"], p["ln2_b"])
    ff = linear_pallas(hn, p["ff_w1"], p["ff_b1"], activation="relu")
    return linear_pallas(ff, p["ff_w2"], p["ff_b2"], residual=h)


def transformer_encoder(p, x, src_key_mask, num_heads):
    T, H = x.shape[1], x.shape[2]
    # TODO(synk): PE add left as one small XLA elementwise pass; could be folded
    # into the preceding LN epilogue with a per-batch grid.
    x = x + sinusoidal_pe(T, H)[None].astype(x.dtype)
    for lp in p["layers"]:
        x = encoder_layer(lp, x, src_key_mask, num_heads)
    return layernorm_pallas(x, p["ln_g"], p["ln_b"])


def word_embeddings(p, tokens, hidden):
    # TODO(synk): embedding gather stays in glue (jnp.take); no matmul hot path.
    emb = jnp.take(p["table"], tokens, axis=0)
    return emb * math.sqrt(hidden)


def decoder_layer(p, x, memory, src_key_mask, trg_key_mask, num_heads):
    xn = layernorm_pallas(x, p["ln1_g"], p["ln1_b"])
    h1 = multi_head_attention(p["self_attn"], xn, xn, trg_key_mask, num_heads,
                              causal=True, residual=x)
    h1n = layernorm_pallas(h1, p["ln2_g"], p["ln2_b"])
    h2 = multi_head_attention(p["cross_attn"], h1n, memory, src_key_mask,
                              num_heads, causal=False, residual=h1)
    h2n = layernorm_pallas(h2, p["ln3_g"], p["ln3_b"])
    ff = linear_pallas(h2n, p["ff_w1"], p["ff_b1"], activation="relu")
    return linear_pallas(ff, p["ff_w2"], p["ff_b2"], residual=h2)


def transformer_decoder(p, trg_embed, encoder_output, src_key_mask,
                        trg_key_mask, num_heads):
    B, T, H = trg_embed.shape
    x = trg_embed + sinusoidal_pe(T, H)[None].astype(trg_embed.dtype)
    for lp in p["layers"]:
        x = decoder_layer(lp, x, encoder_output, src_key_mask, trg_key_mask,
                          num_heads)
    x = layernorm_pallas(x, p["ln_g"], p["ln_b"])
    # decoder logits in f32 (padded vocab; sliced by caller)
    return linear_pallas(x, p["out_w"], p["out_b"], out_dtype=jnp.float32)


def get_key_mask(x_len, T):
    # torch: pos >= len -> masked; keep as small int32 [B, T] (1 == valid)
    pos = jnp.arange(T, dtype=x_len.dtype)[None, :]
    return (pos < x_len[:, None]).astype(jnp.int32)


def sign_model_forward(params, cfg, sgn, sgn_len, text, text_len):
    sgn_mask = get_key_mask(sgn_len, sgn.shape[1])                  # [B, T_sgn]
    x = spatial_embeddings(params["sgn_embedding"], sgn, sgn_mask)
    encoder_output = transformer_encoder(params["encoder"], x, sgn_mask,
                                         cfg["num_heads"])

    # do_recognition: gloss output layer (weights pre-padded; slice real vocab)
    gloss_logits = linear_pallas(encoder_output, params["gloss_w"],
                                 params["gloss_b"], out_dtype=jnp.float32)
    gloss_logits = gloss_logits[..., :cfg["gloss_vocab"]]

    # do_translation
    txt_mask = (text != cfg["pad_idx"]).astype(jnp.int32)           # [B, T_txt]
    txt_embed = word_embeddings(params["text_embedding"], text, cfg["hidden"])
    decoder_logits = transformer_decoder(
        params["decoder"], txt_embed, encoder_output, sgn_mask, txt_mask,
        cfg["num_heads"])
    decoder_logits = decoder_logits[..., :cfg["text_vocab"]]
    return gloss_logits, decoder_logits


# ----------------------------------------------------------------------------
# Deterministic parameter init (weights bf16, pre-padded to lane-aligned N)
# ----------------------------------------------------------------------------
class KeyGen:
    def __init__(self, key):
        self.key = key

    def __call__(self):
        self.key, k = jax.random.split(self.key)
        return k


def dense_init(kg, fan_in, fan_out):
    w = (jax.random.normal(kg(), (fan_in, fan_out)) *
         (1.0 / math.sqrt(fan_in))).astype(jnp.float32)
    b = jnp.zeros((fan_out,), jnp.float32)
    n_pad = _round_up(fan_out, 128) - fan_out
    if n_pad:
        w = jnp.pad(w, ((0, 0), (0, n_pad)))
        b = jnp.pad(b, (0, n_pad))
    return w.astype(jnp.bfloat16), b.astype(jnp.float32)


def ln_init(H):
    return jnp.ones((H,), jnp.float32), jnp.zeros((H,), jnp.float32)


def attn_init(kg, H, cross=False):
    wo, bo = dense_init(kg, H, H)
    if cross:
        wq, bq = dense_init(kg, H, H)
        wkv, bkv = dense_init(kg, H, 2 * H)
        return dict(w_q=wq, b_q=bq, w_kv=wkv, b_kv=bkv, wo=wo, bo=bo)
    wqkv, bqkv = dense_init(kg, H, 3 * H)
    return dict(w_qkv=wqkv, b_qkv=bqkv, wo=wo, bo=bo)


def enc_layer_init(kg, H, F):
    ln1_g, ln1_b = ln_init(H)
    ln2_g, ln2_b = ln_init(H)
    w1, b1 = dense_init(kg, H, F)
    w2, b2 = dense_init(kg, F, H)
    return dict(ln1_g=ln1_g, ln1_b=ln1_b, attn=attn_init(kg, H),
                ln2_g=ln2_g, ln2_b=ln2_b, ff_w1=w1, ff_b1=b1, ff_w2=w2, ff_b2=b2)


def dec_layer_init(kg, H, F):
    ln1_g, ln1_b = ln_init(H)
    ln2_g, ln2_b = ln_init(H)
    ln3_g, ln3_b = ln_init(H)
    w1, b1 = dense_init(kg, H, F)
    w2, b2 = dense_init(kg, F, H)
    return dict(ln1_g=ln1_g, ln1_b=ln1_b, self_attn=attn_init(kg, H),
                ln2_g=ln2_g, ln2_b=ln2_b, cross_attn=attn_init(kg, H, cross=True),
                ln3_g=ln3_g, ln3_b=ln3_b,
                ff_w1=w1, ff_b1=b1, ff_w2=w2, ff_b2=b2)


def init_params(key, cfg):
    kg = KeyGen(key)
    H, F = cfg["hidden"], cfg["ff_size"]

    se_w, se_b = dense_init(kg, cfg["sgn_dim"], H)
    se_ln_g, se_ln_b = ln_init(H)

    enc_ln_g, enc_ln_b = ln_init(H)
    dec_ln_g, dec_ln_b = ln_init(H)

    gloss_w, gloss_b = dense_init(kg, H, cfg["gloss_vocab"])
    dec_out_w, dec_out_b = dense_init(kg, H, cfg["text_vocab"])

    table = (jax.random.normal(kg(), (cfg["text_vocab"], H)) * 0.02
             ).astype(jnp.bfloat16)
    table = table.at[cfg["pad_idx"]].set(0.0)

    return dict(
        sgn_embedding=dict(w=se_w, b=se_b, ln_g=se_ln_g, ln_b=se_ln_b),
        encoder=dict(layers=[enc_layer_init(kg, H, F) for _ in range(cfg["num_layers"])],
                     ln_g=enc_ln_g, ln_b=enc_ln_b),
        gloss_w=gloss_w, gloss_b=gloss_b,
        text_embedding=dict(table=table),
        decoder=dict(layers=[dec_layer_init(kg, H, F) for _ in range(cfg["num_layers"])],
                     ln_g=dec_ln_g, ln_b=dec_ln_b,
                     out_w=dec_out_w, out_b=dec_out_b),
    )


# ----------------------------------------------------------------------------
if __name__ == "__main__":
    cfg = dict(
        sgn_dim=64, hidden=128, ff_size=256, num_heads=4, num_layers=2,
        gloss_vocab=32, text_vocab=32, pad_idx=0,
    )
    B, T_SGN, T_TXT = 2, 16, 8

    root = jax.random.PRNGKey(0)
    k_par, k_sgn, k_txt = jax.random.split(root, 3)

    params = init_params(k_par, cfg)

    sgn = jax.random.normal(k_sgn, (B, T_SGN, cfg["sgn_dim"]), jnp.float32)
    sgn_len = jnp.array([T_SGN, 12], dtype=jnp.int32)           # max == T_SGN
    text = jax.random.randint(k_txt, (B, T_TXT), 1, cfg["text_vocab"], dtype=jnp.int32)
    text_len = jnp.array([T_TXT, 6], dtype=jnp.int32)
    # pad positions beyond text_len with pad_idx
    txt_pos = jnp.arange(T_TXT, dtype=jnp.int32)[None, :]
    text = jnp.where(txt_pos < text_len[:, None], text, cfg["pad_idx"])

    gloss_logits, decoder_logits = sign_model_forward(
        params, cfg, sgn, sgn_len, text, text_len)
    jax.block_until_ready((gloss_logits, decoder_logits))

    assert gloss_logits.shape == (B, T_SGN, cfg["gloss_vocab"])
    assert decoder_logits.shape == (B, T_TXT, cfg["text_vocab"])
    assert bool(jnp.all(jnp.isfinite(gloss_logits)))
    assert bool(jnp.all(jnp.isfinite(decoder_logits)))
    print("KERNEL_OK")
</pallas_src>

<mosaic_0001>
module attributes {stable_mosaic.version = 11 : i64} {
  func.func @_linear_kernel_nosplit(%arg0: i32, %arg1: i32, %arg2: memref<32x64xbf16, #tpu.memory_space<vmem>>, %arg3: memref<64x128xbf16, #tpu.memory_space<vmem>>, %arg4: memref<1x128xf32, #tpu.memory_space<vmem>>, %arg5: memref<32x128xbf16, #tpu.memory_space<vmem>>) attributes {dimension_semantics = [#tpu.dimension_semantics<parallel>, #tpu.dimension_semantics<parallel>], iteration_bounds = array<i64: 1, 1>, scalar_prefetch = 0 : i64, scratch_operands = 0 : i64, tpu.core_type = #tpu.core_type<tc>, window_params = [{transform_indices = @transform_0, window_bounds = array<i64: 32, 64>}, {transform_indices = @transform_1, window_bounds = array<i64: 64, 128>}, {transform_indices = @transform_2, window_bounds = array<i64: 1, 128>}, {transform_indices = @transform_3, window_bounds = array<i64: 32, 128>}]} {
    %c0 = arith.constant 0 : index
    %c0_0 = arith.constant 0 : index
    %0 = vector.load %arg2[%c0, %c0_0] : memref<32x64xbf16, #tpu.memory_space<vmem>>, vector<32x64xbf16>
    %c0_1 = arith.constant 0 : index
    %c0_2 = arith.constant 0 : index
    %1 = vector.load %arg3[%c0_1, %c0_2] : memref<64x128xbf16, #tpu.memory_space<vmem>>, vector<64x128xbf16>
    %cst = arith.constant dense<0.000000e+00> : vector<32x128xf32>
    %2 = tpu.matmul %0, %1, %cst {dimension_numbers = #tpu.dot_dimension_numbers<[1], [0], [0], [1], [0, 0, 1, 1], [], []>} : vector<32x64xbf16>, vector<64x128xbf16>, vector<32x128xf32> -> vector<32x128xf32>
    %c0_3 = arith.constant 0 : index
    %c0_4 = arith.constant 0 : index
    %3 = vector.load %arg4[%c0_3, %c0_4] : memref<1x128xf32, #tpu.memory_space<vmem>>, vector<1x128xf32>
    %4 = vector.broadcast %3 : vector<1x128xf32> to vector<32x128xf32>
    %5 = arith.addf %2, %4 : vector<32x128xf32>
    %6 = arith.truncf %5 : vector<32x128xf32> to vector<32x128xbf16>
    %c0_5 = arith.constant 0 : index
    %c0_6 = arith.constant 0 : index
    %7 = vector.load %arg5[%c0_5, %c0_6] : memref<32x128xbf16, #tpu.memory_space<vmem>>, vector<32x128xbf16>
    tpu.vector_store %arg5[%c0_5, %c0_6], %6 {strides = array<i32>} : memref<32x128xbf16, #tpu.memory_space<vmem>>, vector<32x128xbf16>,
    return
  }
  func.func @transform_0(%arg0: i32, %arg1: i32) -> (i32, i32) {
    %c0_i32 = arith.constant 0 : i32
    %c0_i32_0 = arith.constant 0 : i32
    return %arg0, %c0_i32 : i32, i32
  }
  func.func @transform_1(%arg0: i32, %arg1: i32) -> (i32, i32) {
    %c0_i32 = arith.constant 0 : i32
    %c0_i32_0 = arith.constant 0 : i32
    return %c0_i32, %arg1 : i32, i32
  }
  func.func @transform_2(%arg0: i32, %arg1: i32) -> (i32, i32) {
    %c0_i32 = arith.constant 0 : i32
    %c0_i32_0 = arith.constant 0 : i32
    return %c0_i32, %arg1 : i32, i32
  }
  func.func @transform_3(%arg0: i32, %arg1: i32) -> (i32, i32) {
    %c0_i32 = arith.constant 0 : i32
    return %arg0, %arg1 : i32, i32
  }
}

</mosaic_0001>

<bundles_post_ra>
// kernel: tpu_custom_call.1
= control target key start
LH: loop header
LB: loop body
LE: loop exit
PB: predicated region body
PF: predicated region fallthrough
CT: control target
= control target key end

     0   :  { %8 = vsyncpa [#allocation3], 0  ;;  %s329_s0 = inlined_call_operand.hbm [shape: bf16[32,64], index: 0, kind: input, shape index: {}]   ;;  %s330_s1 = inlined_call_operand.hbm [shape: bf16[64,128], index: 1, kind: input, shape index: {}]   ;;  %s331_s2 = inlined_call_operand.vmem [shape: f32[1,128], index: 2, kind: input, shape index: {}]   ;;  %s332_s3 = inlined_call_operand.hbm [shape: bf16[32,128], index: 3, kind: output, shape index: {}]  }
   0x1   :  { %9 = vsyncpa [#allocation6], 0 }
   0x2   :  { %10 = vsyncpa [#allocation4], 0  ;;  %s15_s14 = sshll.u32 %s329_s0, 4  ;;  %s283_s15 = smov [#allocation2]   ;;  %s16_s14 = int_to_ptr.hbm [resolvable:$true] %s15_s14 }
   0x3   :  { %s17_s16 = sshll.u32 %s283_s15, 4  ;;  %s28_s19 = sshll.u32 %s330_s1, 4  ;;  %s18_s16 = int_to_ptr.vmem [resolvable:$true] %s17_s16  ;;  %s29_s19 = int_to_ptr.hbm [resolvable:$true] %s28_s19 }
   0x4   :  { %s284_s20 = smov 64   ;;  %s285_s21 = smov 4  }
   0x5   :  { %23 = dma.hbm_to_vmem [thread:$0]  %s16_s14, 256, %s18_s16, [#allocation3], %s284_s20, %s284_s20, %s285_s21  }
   0x6   :  { %s286_s22 = smov [#allocation5]  }
   0x7   :  { %s30_s23 = sshll.u32 %s286_s22, 4  ;;  %s31_s23 = int_to_ptr.vmem [resolvable:$true] %s30_s23 }
   0x8   :  { %36 = dma.hbm_to_vmem [thread:$0]  %s29_s19, 512, %s31_s23, [#allocation6], %s284_s20, %s284_s20, %s285_s21  }
   0x9   :  { %277 = dma.done.wait [#allocation3], 256  }
   0xa   :  { %278 = vsyncadd [#allocation3], 4294967040 }
   0xb   :  { %279 = dma.done.wait [#allocation6], 512  }
   0xc   :  { %280 = vsyncadd [#allocation6], 4294966784  ;;  %v183_v0 = vld [vmem:[#allocation5 + $0x18] sm:$0xff]  ;;  %v182_v1 = vld [vmem:[#allocation5 + $0x10] sm:$0xff]  ;;  %vm98_vm0 = vcmask 523264   ;;  %s287_s24 = smov [#allocation7]  }
   0xd   :  { %109 = vmatpush.bf16.msra.mxu0 %v183_v0  ;;  %195 = vmatpush.bf16.msra.mxu1 %v183_v0  ;;  %v181_v2 = vld [vmem:[#allocation5 + $0x8] sm:$0xff]  ;;  %v180_v3 = vld [vmem:[#allocation5] sm:$0xff]  ;;  %v178_v4 = vld [vmem:[#allocation2] sm:$0xff]  ;;  %s136_s25 = sshll.u32 %s287_s24, 4  ;;  %s138_s28 = sshll.u32 %s332_s3, 4  ;;  %s137_s25 = int_to_ptr.vmem [resolvable:$true] %s136_s25  ;;  %s139_s28 = int_to_ptr.hbm [resolvable:$true] %s138_s28 }
   0xe   :  { %v179_v5 = vld [vmem:[#allocation2 + $0x8] sm:$0xff]  ;;  %v204_v8 = vld [vmem:[%s331_s2] ss:$0 sm:$0xff] }
  0x11   :  { %110 = vmatpush.bf16.msra.mxu0 %v182_v1  ;;  %196 = vmatpush.bf16.msra.mxu1 %v182_v1 }
  0x15   :  { %111 = vmatpush.bf16.msra.mxu0 %v181_v2  ;;  %197 = vmatpush.bf16.msra.mxu1 %v181_v2 }
  0x19   :  { %112 = vmatpush.bf16.msra.mxu0 %v180_v3  ;;  %198 = vmatpush.bf16.msra.mxu1 %v180_v3 }
  0x1c   :  { %176 = vmatmul.msk.bf16.vlgmr.msra.gmra.mxu0 %vm98_vm0, %v178_v4  ;;  %177 = vmatmul.msk.bf16.vlgmr.msra.gmra.mxu1 %vm98_vm0, %v179_v5 }
  0x99   :  { %v114_v6 = vpop.f32.mrf.mxu0  ;;  %v119_v7 = vpop.f32.mrf.mxu1 }
  0x9a   :  { %v115_v11 = vadd.f32 %v204_v8, %v114_v6  ;;  %v120_v12 = vadd.f32 %v204_v8, %v119_v7 }
  0xa1   :  { %v116_v9 = vpop.f32.mrf.mxu0  ;;  %v121_v10 = vpop.f32.mrf.mxu1 }
  0xa2   :  { %v117_v13 = vadd.f32 %v204_v8, %v116_v9  ;;  %v122_v14 = vadd.f32 %v204_v8, %v121_v10 }
  0xa4   :  { %v187_v15 = vpack.c.bf16 %v117_v13, %v115_v11  ;;  %v192_v16 = vpack.c.bf16 %v122_v14, %v120_v12 }
  0xa6   :  { %188 = vst [vmem:[#allocation7] sm:$0xff] %v187_v15  }
  0xa7   :  { %194 = vst [vmem:[#allocation7 + $0x8] sm:$0xff] %v192_v16  }
  0xa8   :  { %144 = dma.vmem_to_hbm [thread:$0]  %s137_s25, 256, %s139_s28, [#allocation4], %s284_s20, %s284_s20, %s285_s21  }
  0xa9   :  { %281 = dma.done.wait [#allocation4], 256  }
  0xaa   :  { %282 = vsyncadd [#allocation4], 4294967040 }
  0xab   :  { %149 = vsyncpa [#allocation3], 1 }
  0xac   :  { %150 = vsyncpa [#allocation6], 1 }
  0xad   :  { %151 = vsyncpa [#allocation4], 1 }

</bundles_post_ra>
